<compile_context>
chip_gen: v5e
topology: v5e:2x2
jax: 0.10.0
libtpu: 0.0.40
codegen_flags: <defaults>
</compile_context>

<pallas_src>
import jax
import jax.numpy as jnp
from jax.experimental import pallas as pl
from jax.experimental.pallas import tpu as pltpu

EPS = 1e-5  # torch.nn.LayerNorm default eps


# ---------------------------------------------------------------------------
# Kernel: y = Linear2(LayerNorm(ReLU(Linear1(x))))
#   x_ref : (tb, num_inputs)
#   w1    : (num_inputs, num_hiddens)   b1/gamma/beta : (1, num_hiddens)
#   w2    : (num_hiddens, n_pad)        b2            : (1, n_pad)
#   o_ref : (tb, n_pad)                 (n_pad = round_up(num_class, 128))
# ---------------------------------------------------------------------------
def class_pred_kernel(x_ref, w1_ref, b1_ref, g_ref, be_ref, w2_ref, b2_ref,
                      o_ref):
    x = x_ref[...]

    # Linear 1 + ReLU
    h = jnp.dot(x, w1_ref[...], preferred_element_type=jnp.float32) + b1_ref[...]
    h = jnp.maximum(h, 0.0)

    # LayerNorm (biased variance, matches torch.nn.LayerNorm)
    mean = jnp.mean(h, axis=-1, keepdims=True)
    var = jnp.mean((h - mean) ** 2, axis=-1, keepdims=True)
    h = (h - mean) * jax.lax.rsqrt(var + EPS) * g_ref[...] + be_ref[...]

    # Linear 2 (lane-dense padded output)
    o_ref[...] = (jnp.dot(h, w2_ref[...], preferred_element_type=jnp.float32)
                  + b2_ref[...])


# ---------------------------------------------------------------------------
# Wrapper: pads the final layer to a 128-lane multiple, sets up the grid.
# ---------------------------------------------------------------------------
def class_pred(x, w1, b1, gamma, beta, w2, b2, *, block_b=128):
    B, num_inputs = x.shape
    num_class = w2.shape[1]

    # Lane-dense output slab: zero-pad final-layer weights/bias to n_pad lanes.
    n_pad = pl.cdiv(num_class, 128) * 128
    if n_pad != num_class:
        w2 = jnp.pad(w2, ((0, 0), (0, n_pad - num_class)))
        b2 = jnp.pad(b2, ((0, 0), (0, n_pad - num_class)))

    # Batch tiling: tile rows only when the batch divides evenly into the
    # requested tile; otherwise the whole batch is one block (full-array
    # blocks are always layout-legal).
    tb = block_b if (B % block_b == 0) else B
    grid = (B // tb,)

    weights = [w1, b1, gamma, beta, w2, b2]

    def full_spec(a):
        return pl.BlockSpec(a.shape, lambda i, _nd=a.ndim: (0,) * _nd)

    grid_spec = pltpu.PrefetchScalarGridSpec(
        num_scalar_prefetch=0,
        grid=grid,
        in_specs=[pl.BlockSpec((tb, num_inputs), lambda i: (i, 0))]
                 + [full_spec(w) for w in weights],
        out_specs=pl.BlockSpec((tb, n_pad), lambda i: (i, 0)),
    )

    out = pl.pallas_call(
        class_pred_kernel,
        out_shape=jax.ShapeDtypeStruct((B, n_pad), jnp.float32),
        grid_spec=grid_spec,
        compiler_params=pltpu.CompilerParams(
            dimension_semantics=("parallel",),      # batch axis shards across TCs (v7x)
            vmem_limit_bytes=32 * 1024 * 1024,
        ),
    )(x, *weights)

    return out[:, :num_class]


# Pure-JAX reference (mirrors the torch module) for a correctness check.
def class_pred_ref(x, w1, b1, gamma, beta, w2, b2):
    h = jnp.maximum(x @ w1 + b1, 0.0)
    mean = h.mean(-1, keepdims=True)
    var = ((h - mean) ** 2).mean(-1, keepdims=True)
    h = (h - mean) / jnp.sqrt(var + EPS) * gamma + beta
    return h @ w2 + b2


if __name__ == "__main__":
    # Small shapes consistent with the module's use in CHET:
    # ClassPred(num_inputs=32, num_hiddens=500, num_class=240).
    B, num_inputs, num_hiddens, num_class = 2, 32, 500, 240

    key = jax.random.PRNGKey(0)
    kx, k1, kb1, k2, kb2 = jax.random.split(key, 5)

    x = jax.random.normal(kx, (B, num_inputs), dtype=jnp.float32)
    w1 = 0.02 * jax.random.normal(k1, (num_inputs, num_hiddens), dtype=jnp.float32)
    b1 = 0.02 * jax.random.normal(kb1, (1, num_hiddens), dtype=jnp.float32)
    gamma = jnp.ones((1, num_hiddens), jnp.float32)
    beta = jnp.zeros((1, num_hiddens), jnp.float32)
    w2 = 0.02 * jax.random.normal(k2, (num_hiddens, num_class), dtype=jnp.float32)
    b2 = 0.02 * jax.random.normal(kb2, (1, num_class), dtype=jnp.float32)

    fwd = jax.jit(class_pred)
    out = fwd(x, w1, b1, gamma, beta, w2, b2)
    out = jax.block_until_ready(out)

    assert out.shape == (B, num_class)
    assert bool(jnp.all(jnp.isfinite(out)))

    ref = class_pred_ref(x, w1, b1, gamma, beta, w2, b2)
    assert bool(jnp.allclose(out, ref, atol=1e-2, rtol=1e-2)), \
        f"max abs diff {float(jnp.max(jnp.abs(out - ref)))}"

    print("KERNEL_OK")
</pallas_src>

<mosaic_0001>
module attributes {stable_mosaic.version = 11 : i64} {
  func.func @class_pred_kernel(%arg0: i32, %arg1: memref<2x32xf32, #tpu.memory_space<vmem>>, %arg2: memref<32x500xf32, #tpu.memory_space<vmem>>, %arg3: memref<1x500xf32, #tpu.memory_space<vmem>>, %arg4: memref<1x500xf32, #tpu.memory_space<vmem>>, %arg5: memref<1x500xf32, #tpu.memory_space<vmem>>, %arg6: memref<500x256xf32, #tpu.memory_space<vmem>>, %arg7: memref<1x256xf32, #tpu.memory_space<vmem>>, %arg8: memref<2x256xf32, #tpu.memory_space<vmem>>) attributes {dimension_semantics = [#tpu.dimension_semantics<parallel>], iteration_bounds = array<i64: 1>, scalar_prefetch = 0 : i64, scratch_operands = 0 : i64, tpu.core_type = #tpu.core_type<tc>, window_params = [{transform_indices = @transform_0, window_bounds = array<i64: 2, 32>}, {pipeline_mode = #tpu.pipeline_mode<synchronous>, transform_indices = @transform_1, window_bounds = array<i64: 32, 500>}, {pipeline_mode = #tpu.pipeline_mode<synchronous>, transform_indices = @transform_2, window_bounds = array<i64: 1, 500>}, {pipeline_mode = #tpu.pipeline_mode<synchronous>, transform_indices = @transform_3, window_bounds = array<i64: 1, 500>}, {pipeline_mode = #tpu.pipeline_mode<synchronous>, transform_indices = @transform_4, window_bounds = array<i64: 1, 500>}, {pipeline_mode = #tpu.pipeline_mode<synchronous>, transform_indices = @transform_5, window_bounds = array<i64: 500, 256>}, {pipeline_mode = #tpu.pipeline_mode<synchronous>, transform_indices = @transform_6, window_bounds = array<i64: 1, 256>}, {transform_indices = @transform_7, window_bounds = array<i64: 2, 256>}]} {
    %c0 = arith.constant 0 : index
    %c0_0 = arith.constant 0 : index
    %0 = vector.load %arg1[%c0, %c0_0] : memref<2x32xf32, #tpu.memory_space<vmem>>, vector<2x32xf32>
    %c0_1 = arith.constant 0 : index
    %c0_2 = arith.constant 0 : index
    %1 = vector.load %arg2[%c0_1, %c0_2] : memref<32x500xf32, #tpu.memory_space<vmem>>, vector<32x500xf32>
    %cst = arith.constant dense<0.000000e+00> : vector<2x500xf32>
    %2 = tpu.matmul %0, %1, %cst {dimension_numbers = #tpu.dot_dimension_numbers<[1], [0], [0], [1], [0, 0, 1, 1], [], []>} : vector<2x32xf32>, vector<32x500xf32>, vector<2x500xf32> -> vector<2x500xf32>
    %c0_3 = arith.constant 0 : index
    %c0_4 = arith.constant 0 : index
    %3 = vector.load %arg3[%c0_3, %c0_4] : memref<1x500xf32, #tpu.memory_space<vmem>>, vector<1x500xf32>
    %4 = vector.broadcast %3 : vector<1x500xf32> to vector<2x500xf32>
    %5 = arith.addf %2, %4 : vector<2x500xf32>
    %cst_5 = arith.constant 0.000000e+00 : f32
    %6 = vector.broadcast %cst_5 : f32 to vector<2x500xf32>
    %7 = arith.maximumf %5, %6 : vector<2x500xf32>
    %cst_6 = arith.constant dense<0.000000e+00> : vector<2xf32>
    %8 = vector.multi_reduction <add>, %7, %cst_6 [1] : vector<2x500xf32> to vector<2xf32>
    %9 = vector.shape_cast %8 : vector<2xf32> to vector<2x1xf32>
    %cst_7 = arith.constant 5.000000e+02 : f32
    %10 = vector.broadcast %cst_7 : f32 to vector<2x1xf32>
    %11 = arith.divf %9, %10 : vector<2x1xf32>
    %12 = vector.broadcast %11 : vector<2x1xf32> to vector<2x500xf32>
    %13 = arith.subf %7, %12 : vector<2x500xf32>
    %14 = arith.mulf %13, %13 : vector<2x500xf32>
    %cst_8 = arith.constant dense<0.000000e+00> : vector<2xf32>
    %15 = vector.multi_reduction <add>, %14, %cst_8 [1] : vector<2x500xf32> to vector<2xf32>
    %16 = vector.shape_cast %15 : vector<2xf32> to vector<2x1xf32>
    %cst_9 = arith.constant 5.000000e+02 : f32
    %17 = vector.broadcast %cst_9 : f32 to vector<2x1xf32>
    %18 = arith.divf %16, %17 : vector<2x1xf32>
    %19 = vector.broadcast %11 : vector<2x1xf32> to vector<2x500xf32>
    %20 = arith.subf %7, %19 : vector<2x500xf32>
    %cst_10 = arith.constant 9.99999974E-6 : f32
    %21 = vector.broadcast %cst_10 : f32 to vector<2x1xf32>
    %22 = arith.addf %18, %21 : vector<2x1xf32>
    %23 = math.rsqrt %22 : vector<2x1xf32>
    %24 = vector.broadcast %23 : vector<2x1xf32> to vector<2x500xf32>
    %25 = arith.mulf %20, %24 : vector<2x500xf32>
    %c0_11 = arith.constant 0 : index
    %c0_12 = arith.constant 0 : index
    %26 = vector.load %arg4[%c0_11, %c0_12] : memref<1x500xf32, #tpu.memory_space<vmem>>, vector<1x500xf32>
    %27 = vector.broadcast %26 : vector<1x500xf32> to vector<2x500xf32>
    %28 = arith.mulf %25, %27 : vector<2x500xf32>
    %c0_13 = arith.constant 0 : index
    %c0_14 = arith.constant 0 : index
    %29 = vector.load %arg5[%c0_13, %c0_14] : memref<1x500xf32, #tpu.memory_space<vmem>>, vector<1x500xf32>
    %30 = vector.broadcast %29 : vector<1x500xf32> to vector<2x500xf32>
    %31 = arith.addf %28, %30 : vector<2x500xf32>
    %c0_15 = arith.constant 0 : index
    %c0_16 = arith.constant 0 : index
    %32 = vector.load %arg6[%c0_15, %c0_16] : memref<500x256xf32, #tpu.memory_space<vmem>>, vector<500x256xf32>
    %cst_17 = arith.constant dense<0.000000e+00> : vector<2x256xf32>
    %33 = tpu.matmul %31, %32, %cst_17 {dimension_numbers = #tpu.dot_dimension_numbers<[1], [0], [0], [1], [0, 0, 1, 1], [], []>} : vector<2x500xf32>, vector<500x256xf32>, vector<2x256xf32> -> vector<2x256xf32>
    %c0_18 = arith.constant 0 : index
    %c0_19 = arith.constant 0 : index
    %34 = vector.load %arg7[%c0_18, %c0_19] : memref<1x256xf32, #tpu.memory_space<vmem>>, vector<1x256xf32>
    %35 = vector.broadcast %34 : vector<1x256xf32> to vector<2x256xf32>
    %36 = arith.addf %33, %35 : vector<2x256xf32>
    %c0_20 = arith.constant 0 : index
    %c0_21 = arith.constant 0 : index
    %37 = vector.load %arg8[%c0_20, %c0_21] : memref<2x256xf32, #tpu.memory_space<vmem>>, vector<2x256xf32>
    tpu.vector_store %arg8[%c0_20, %c0_21], %36 {strides = array<i32>} : memref<2x256xf32, #tpu.memory_space<vmem>>, vector<2x256xf32>,
    return
  }
  func.func @transform_0(%arg0: i32) -> (i32, i32) {
    %c0_i32 = arith.constant 0 : i32
    %c0_i32_0 = arith.constant 0 : i32
    return %arg0, %c0_i32 : i32, i32
  }
  func.func @transform_1(%arg0: i32) -> (i32, i32) {
    %c0_i32 = arith.constant 0 : i32
    %c0_i32_0 = arith.constant 0 : i32
    %c0_i32_1 = arith.constant 0 : i32
    return %c0_i32, %c0_i32_0 : i32, i32
  }
  func.func @transform_2(%arg0: i32) -> (i32, i32) {
    %c0_i32 = arith.constant 0 : i32
    %c0_i32_0 = arith.constant 0 : i32
    %c0_i32_1 = arith.constant 0 : i32
    return %c0_i32, %c0_i32_0 : i32, i32
  }
  func.func @transform_3(%arg0: i32) -> (i32, i32) {
    %c0_i32 = arith.constant 0 : i32
    %c0_i32_0 = arith.constant 0 : i32
    %c0_i32_1 = arith.constant 0 : i32
    return %c0_i32, %c0_i32_0 : i32, i32
  }
  func.func @transform_4(%arg0: i32) -> (i32, i32) {
    %c0_i32 = arith.constant 0 : i32
    %c0_i32_0 = arith.constant 0 : i32
    %c0_i32_1 = arith.constant 0 : i32
    return %c0_i32, %c0_i32_0 : i32, i32
  }
  func.func @transform_5(%arg0: i32) -> (i32, i32) {
    %c0_i32 = arith.constant 0 : i32
    %c0_i32_0 = arith.constant 0 : i32
    %c0_i32_1 = arith.constant 0 : i32
    return %c0_i32, %c0_i32_0 : i32, i32
  }
  func.func @transform_6(%arg0: i32) -> (i32, i32) {
    %c0_i32 = arith.constant 0 : i32
    %c0_i32_0 = arith.constant 0 : i32
    %c0_i32_1 = arith.constant 0 : i32
    return %c0_i32, %c0_i32_0 : i32, i32
  }
  func.func @transform_7(%arg0: i32) -> (i32, i32) {
    %c0_i32 = arith.constant 0 : i32
    %c0_i32_0 = arith.constant 0 : i32
    return %arg0, %c0_i32 : i32, i32
  }
}

</mosaic_0001>

<bundles_post_ra>
// kernel: class_pred.1
= control target key start
LH: loop header
LB: loop body
LE: loop exit
PB: predicated region body
PF: predicated region fallthrough
CT: control target
= control target key end

     0   :  { %vm54_vm0 = vcmask 261120   ;;  %s1143_s0 = inlined_call_operand.vmem [shape: f32[2,32], index: 0, kind: input, shape index: {}]   ;;  %s1144_s1 = inlined_call_operand.vmem [shape: f32[32,500], index: 1, kind: input, shape index: {}]   ;;  %s1145_s2 = inlined_call_operand.vmem [shape: f32[1,500], index: 2, kind: input, shape index: {}]   ;;  %s1146_s3 = inlined_call_operand.vmem [shape: f32[1,500], index: 3, kind: input, shape index: {}]   ;;  %s1147_s4 = inlined_call_operand.vmem [shape: f32[1,500], index: 4, kind: input, shape index: {}]   ;;  %s1148_s5 = inlined_call_operand.vmem [shape: f32[500,256], index: 5, kind: input, shape index: {}]   ;;  %s1149_s6 = inlined_call_operand.vmem [shape: f32[1,256], index: 6, kind: input, shape index: {}]   ;;  %s1150_s7 = inlined_call_operand.hbm [shape: f32[2,256], index: 7, kind: output, shape index: {}]  }
   0x1   :  { %v42_v0 = vld [vmem:[%s1144_s1 + $0x70] sm:$0xff]  ;;  %v43_v2 = vld [vmem:[%s1144_s1 + $0x78] sm:$0xff]  ;;  %v40_v3 = vld [vmem:[%s1144_s1 + $0x60] sm:$0xff] }
   0x2   :  { %v38_v1 = vld [vmem:[%s1144_s1 + $0x50] sm:$0xff]  ;;  %110 = vmatpush.msra.mxu2 %v42_v0  ;;  %130 = vmatpush.msra.mxu3 %v43_v2  ;;  %v41_v4 = vld [vmem:[%s1144_s1 + $0x68] sm:$0xff]  ;;  %v39_v6 = vld [vmem:[%s1144_s1 + $0x58] sm:$0xff] }
   0x3   :  { %v34_v5 = vld [vmem:[%s1144_s1 + $0x30] sm:$0xff]  ;;  %70 = vmatpush.msra.mxu0 %v40_v3  ;;  %90 = vmatpush.msra.mxu1 %v41_v4  ;;  %v36_v7 = vld [vmem:[%s1144_s1 + $0x40] sm:$0xff]  ;;  %v37_v8 = vld [vmem:[%s1144_s1 + $0x48] sm:$0xff] }
   0x4   :  { %111 = vmatpush.msra.mxu2 %v38_v1  ;;  %131 = vmatpush.msra.mxu3 %v39_v6  ;;  %v30_v9 = vld [vmem:[%s1144_s1 + $0x10] sm:$0xff]  ;;  %v35_v10 = vld [vmem:[%s1144_s1 + $0x38] sm:$0xff]  ;;  %v32_v11 = vld [vmem:[%s1144_s1 + $0x20] sm:$0xff] }
   0x5   :  { %71 = vmatpush.msra.mxu0 %v36_v7  ;;  %91 = vmatpush.msra.mxu1 %v37_v8  ;;  %v33_v12 = vld [vmem:[%s1144_s1 + $0x28] sm:$0xff]  ;;  %v31_v13 = vld [vmem:[%s1144_s1 + $0x18] sm:$0xff]  ;;  %v27_v14 = vld [vmem:[%s1143_s0] sm:$0x3] }
   0x6   :  { %112 = vmatpush.msra.mxu2 %v34_v5  ;;  %132 = vmatpush.msra.mxu3 %v35_v10  ;;  %v28_v15 = vld [vmem:[%s1144_s1] sm:$0xff]  ;;  %v29_v16 = vld [vmem:[%s1144_s1 + $0x8] sm:$0xff] }
   0x7   :  { %72 = vmatpush.msra.mxu0 %v32_v11  ;;  %92 = vmatpush.msra.mxu1 %v33_v12 }
   0x8   :  { %12 = vsyncpa [#allocation3], 0  ;;  %113 = vmatpush.msra.mxu2 %v30_v9  ;;  %133 = vmatpush.msra.mxu3 %v31_v13  ;;  %v44_v17 = vld [vmem:[%s1145_s2] sm:$0xf]  ;;  %vm142_vm1 = vcmask 1041408   ;;  %vm148_vm2 = vcmask 943104  }
   0x9   :  { %549 = vmatmul.msk.f32.vlgmr.msra.gmra.mxu2 %vm54_vm0, %v27_v14  ;;  %550 = vmatmul.msk.f32.vlgmr.msra.gmra.mxu3 %vm54_vm0, %v27_v14  ;;  %v46_v18 = vperm.slane %v44_v17, 0  ;;  %v47_v19 = vperm.slane %v44_v17, 1  ;;  %v48_v24 = vperm.slane %v44_v17, 2  ;;  %v49_v25 = vperm.slane %v44_v17, 3  ;;  %v252_v44 = vld [vmem:[%s1148_s5 + $0xf0] sm:$0xff]  ;;  %v250_v46 = vld [vmem:[%s1148_s5 + $0xe0] sm:$0xff] }
   0xa   :  { %73 = vmatpush.msra.mxu0 %v28_v15  ;;  %93 = vmatpush.msra.mxu1 %v29_v16  ;;  %v587_v41 = vmov 500.0   ;;  %v284_v45 = vld [vmem:[%s1148_s5 + $0x1f0] sm:$0xff]  ;;  %vm358_vm3 = vcmask 1043456   ;;  %v282_v47 = vld [vmem:[%s1148_s5 + $0x1e0] sm:$0xff]  ;;  %vm354_vm8 = vcmask 949248   ;;  %s538_s0 = sshll.u32 %s1150_s7, 4  ;;  %s539_s0 = int_to_ptr.hbm [resolvable:$true] %s538_s0 }
   0xb   :  { %547 = vmatmul.msk.f32.vlgmr.msra.gmra.mxu0 %vm54_vm0, %v27_v14  ;;  %548 = vmatmul.msk.f32.vlgmr.msra.gmra.mxu1 %vm54_vm0, %v27_v14  ;;  %557 = vrcp.f32 %v587_v41  ;;  %v316_v48 = vld [vmem:[%s1148_s5 + $0x2f0] sm:$0xff]  ;;  %v346_v49 = vld [vmem:[%s1148_s5 + $0x3e0] sm:$0xf] }
   0xc   :  { %365 = vmatpush.msrb.mxu0 %v252_v44  ;;  %385 = vmatpush.msrb.mxu1 %v284_v45  ;;  %v248_v50 = vld [vmem:[%s1148_s5 + $0xd0] sm:$0xff]  ;;  %v314_v52 = vld [vmem:[%s1148_s5 + $0x2e0] sm:$0xff] }
   0xd   :  { %405 = vmatpush.msrb.mxu2 %v316_v48  ;;  %551 = vmatpush.msk.msrb.mxu3 %vm358_vm3, %v346_v49  ;;  %v280_v51 = vld [vmem:[%s1148_s5 + $0x1d0] sm:$0xff]  ;;  %v246_v54 = vld [vmem:[%s1148_s5 + $0xc0] sm:$0xff] }
   0xe   :  { %366 = vmatpush.msrb.mxu0 %v250_v46  ;;  %386 = vmatpush.msrb.mxu1 %v282_v47  ;;  %v344_v53 = vld [vmem:[%s1148_s5 + $0x3d0] sm:$0xff]  ;;  %v278_v56 = vld [vmem:[%s1148_s5 + $0x1c0] sm:$0xff] }
   0xf   :  { %406 = vmatpush.msrb.mxu2 %v314_v52  ;;  %427 = vmatpush.msrb.mxu3 %v344_v53  ;;  %v312_v57 = vld [vmem:[%s1148_s5 + $0x2d0] sm:$0xff]  ;;  %v342_v58 = vld [vmem:[%s1148_s5 + $0x3c0] sm:$0xff] }
  0x10   :  { %367 = vmatpush.msrb.mxu0 %v248_v50  ;;  %387 = vmatpush.msrb.mxu1 %v280_v51  ;;  %v310_v59 = vld [vmem:[%s1148_s5 + $0x2c0] sm:$0xff]  ;;  %v340_v60 = vld [vmem:[%s1148_s5 + $0x3b0] sm:$0xff] }
  0x11   :  { %v707_v42 = vpop.eup %557  ;;  %407 = vmatpush.msrb.mxu2 %v312_v57  ;;  %428 = vmatpush.msrb.mxu3 %v342_v58  ;;  %v244_v61 = vld [vmem:[%s1148_s5 + $0xb0] sm:$0xff]  ;;  %v338_v0 = vld [vmem:[%s1148_s5 + $0x3a0] sm:$0xff] }
  0x12   :  { %v154_v43 = vmul.f32 500.0, %v707_v42  ;;  %v276_v62 = vld [vmem:[%s1148_s5 + $0x1b0] sm:$0xff]  ;;  %368 = vmatpush.msrb.mxu0 %v246_v54  ;;  %388 = vmatpush.msrb.mxu1 %v278_v56  ;;  %v242_v2 = vld [vmem:[%s1148_s5 + $0xa0] sm:$0xff]  ;;  %vm158_vm4 = vweird.f32 %v707_v42 }
  0x13   :  { %v308_v63 = vld [vmem:[%s1148_s5 + $0x2b0] sm:$0xff]  ;;  %408 = vmatpush.msrb.mxu2 %v310_v59  ;;  %429 = vmatpush.msrb.mxu3 %v340_v60  ;;  %v274_v3 = vld [vmem:[%s1148_s5 + $0x1a0] sm:$0xff] }
  0x14   :  { %v155_v55 = vsub.f32 1.0, %v154_v43  ;;  %369 = vmatpush.msrb.mxu0 %v244_v61  ;;  %389 = vmatpush.msrb.mxu1 %v276_v62  ;;  %v306_v4 = vld [vmem:[%s1148_s5 + $0x2a0] sm:$0xff]  ;;  %v336_v5 = vld [vmem:[%s1148_s5 + $0x390] sm:$0xff] }
  0x15   :  { %409 = vmatpush.msrb.mxu2 %v308_v63  ;;  %430 = vmatpush.msrb.mxu3 %v338_v0  ;;  %v240_v6 = vld [vmem:[%s1148_s5 + $0x90] sm:$0xff]  ;;  %v334_v9 = vld [vmem:[%s1148_s5 + $0x380] sm:$0xff]  ;;  %v253_v63 = vld [vmem:[%s1148_s5 + $0xf8] sm:$0xff] }
  0x16   :  { %v156_v1 = vmul.f32 %v707_v42, %v155_v55  ;;  %v272_v7 = vld [vmem:[%s1148_s5 + $0x190] sm:$0xff]  ;;  %370 = vmatpush.msrb.mxu0 %v242_v2  ;;  %390 = vmatpush.msrb.mxu1 %v274_v3  ;;  %v238_v11 = vld [vmem:[%s1148_s5 + $0x80] sm:$0xff]  ;;  %v285_v0 = vld [vmem:[%s1148_s5 + $0x1f8] sm:$0xff] }
  0x17   :  { %v304_v8 = vld [vmem:[%s1148_s5 + $0x290] sm:$0xff]  ;;  %410 = vmatpush.msrb.mxu2 %v306_v4  ;;  %431 = vmatpush.msrb.mxu3 %v336_v5  ;;  %v270_v12 = vld [vmem:[%s1148_s5 + $0x180] sm:$0xff]  ;;  %v251_v3 = vld [vmem:[%s1148_s5 + $0xe8] sm:$0xff] }
  0x18   :  { %v157_v10 = vadd.f32 %v707_v42, %v156_v1  ;;  %371 = vmatpush.msrb.mxu0 %v240_v6  ;;  %391 = vmatpush.msrb.mxu1 %v272_v7  ;;  %v302_v13 = vld [vmem:[%s1148_s5 + $0x280] sm:$0xff]  ;;  %v332_v14 = vld [vmem:[%s1148_s5 + $0x370] sm:$0xff]  ;;  %v317_v1 = vld [vmem:[%s1148_s5 + $0x2f8] sm:$0xff] }
  0x19   :  { %411 = vmatpush.msrb.mxu2 %v304_v8  ;;  %432 = vmatpush.msrb.mxu3 %v334_v9  ;;  %v236_v15 = vld [vmem:[%s1148_s5 + $0x70] sm:$0xff]  ;;  %v226_v51 = vld [vmem:[%s1148_s5 + $0x20] sm:$0xff]  ;;  %v283_v4 = vld [vmem:[%s1148_s5 + $0x1e8] sm:$0xff] }
  0x1a   :  { %v268_v16 = vld [vmem:[%s1148_s5 + $0x170] sm:$0xff]  ;;  %372 = vmatpush.msrb.mxu0 %v238_v11  ;;  %392 = vmatpush.msrb.mxu1 %v270_v12  ;;  %v258_v52 = vld [vmem:[%s1148_s5 + $0x120] sm:$0xff]  ;;  %v315_v5 = vld [vmem:[%s1148_s5 + $0x2e8] sm:$0xff] }
  0x1b   :  { %v300_v17 = vld [vmem:[%s1148_s5 + $0x270] sm:$0xff]  ;;  %412 = vmatpush.msrb.mxu2 %v302_v13  ;;  %433 = vmatpush.msrb.mxu3 %v332_v14  ;;  %v322_v54 = vld [vmem:[%s1148_s5 + $0x320] sm:$0xff]  ;;  %v347_v6 = vld [vmem:[%s1148_s5 + $0x3e8] sm:$0xf] }
  0x1c   :  { %373 = vmatpush.msrb.mxu0 %v236_v15  ;;  %393 = vmatpush.msrb.mxu1 %v268_v16  ;;  %v292_v53 = vld [vmem:[%s1148_s5 + $0x230] sm:$0xff]  ;;  %v290_v57 = vld [vmem:[%s1148_s5 + $0x220] sm:$0xff]  ;;  %v249_v7 = vld [vmem:[%s1148_s5 + $0xd8] sm:$0xff] }
  0x1d   :  { %413 = vmatpush.msrb.mxu2 %v300_v17  ;;  %v224_v55 = vld [vmem:[%s1148_s5 + $0x10] sm:$0xff]  ;;  %v222_v59 = vld [vmem:[%s1148_s5] sm:$0xff]  ;;  %v281_v8 = vld [vmem:[%s1148_s5 + $0x1d8] sm:$0xff] }
  0x1e   :  { %v256_v56 = vld [vmem:[%s1148_s5 + $0x110] sm:$0xff]  ;;  %v254_v60 = vld [vmem:[%s1148_s5 + $0x100] sm:$0xff]  ;;  %v313_v9 = vld [vmem:[%s1148_s5 + $0x2d8] sm:$0xff] }
  0x1f   :  { %v320_v58 = vld [vmem:[%s1148_s5 + $0x310] sm:$0xff]  ;;  %v318_v62 = vld [vmem:[%s1148_s5 + $0x300] sm:$0xff]  ;;  %v247_v11 = vld [vmem:[%s1148_s5 + $0xc8] sm:$0xff] }
  0x20   :  { %v288_v61 = vld [vmem:[%s1148_s5 + $0x210] sm:$0xff]  ;;  %v286_v2 = vld [vmem:[%s1148_s5 + $0x200] sm:$0xff]  ;;  %v279_v12 = vld [vmem:[%s1148_s5 + $0x1c8] sm:$0xff] }
  0x21   :  { %v311_v13 = vld [vmem:[%s1148_s5 + $0x2c8] sm:$0xff]  ;;  %v245_v15 = vld [vmem:[%s1148_s5 + $0xb8] sm:$0xff] }
  0x22   :  { %v343_v14 = vld [vmem:[%s1148_s5 + $0x3c8] sm:$0xff]  ;;  %v277_v16 = vld [vmem:[%s1148_s5 + $0x1b8] sm:$0xff] }
  0x23   :  { %v309_v17 = vld [vmem:[%s1148_s5 + $0x2b8] sm:$0xff] }
  0x88   :  { %v75_v20 = vpop.f32.mrf.mxu0  ;;  %v95_v21 = vpop.f32.mrf.mxu1 }
  0x89   :  { %v683_v22 = vadd.f32 %v75_v20, %v46_v18  ;;  %v685_v23 = vadd.f32 %v95_v21, %v47_v19  ;;  %v330_v18 = vld [vmem:[%s1148_s5 + $0x360] sm:$0xff]  ;;  %v823_v19 = vsel %vm158_vm4, %v707_v42, %v157_v10  ;;  %v345_v10 = vld [vmem:[%s1148_s5 + $0x3d8] sm:$0xff] }
  0x8a   :  { %v234_v20 = vld [vmem:[%s1148_s5 + $0x60] sm:$0xff]  ;;  %434 = vmatpush.msrb.mxu3 %v330_v18  ;;  %v341_v18 = vld [vmem:[%s1148_s5 + $0x3b8] sm:$0xff] }
  0x8b   :  { %v138_v26 = vmax.f32 %v683_v22, 0.0  ;;  %v139_v27 = vmax.f32 %v685_v23, 0.0  ;;  %v266_v21 = vld [vmem:[%s1148_s5 + $0x160] sm:$0xff]  ;;  %374 = vmatpush.msrb.mxu0 %v234_v20  ;;  %v228_v23 = vld [vmem:[%s1148_s5 + $0x30] sm:$0xff]  ;;  %v243_v20 = vld [vmem:[%s1148_s5 + $0xa8] sm:$0xff] }
  0x8c   :  { %v115_v28 = vpop.f32.mrf.mxu2  ;;  %v135_v29 = vpop.f32.mrf.mxu3  ;;  %394 = vmatpush.msrb.mxu1 %v266_v21  ;;  %v262_v42 = vld [vmem:[%s1148_s5 + $0x140] sm:$0xff]  ;;  %v275_v21 = vld [vmem:[%s1148_s5 + $0x1a8] sm:$0xff] }
  0x8d   :  { %v143_v30 = vsel %vm142_vm1, %v138_v26, 0.0  ;;  %v144_v31 = vsel %vm142_vm1, %v139_v27, 0.0  ;;  %v695_v32 = vadd.f32 %v115_v28, %v48_v24  ;;  %v697_v33 = vadd.f32 %v135_v29, %v49_v25  ;;  %v298_v24 = vld [vmem:[%s1148_s5 + $0x260] sm:$0xff]  ;;  %v328_v25 = vld [vmem:[%s1148_s5 + $0x350] sm:$0xff] }
  0x8e   :  { %v145_v34 = vadd.f32 %v144_v31, %v143_v30  ;;  %v232_v29 = vld [vmem:[%s1148_s5 + $0x50] sm:$0xff]  ;;  %414 = vmatpush.msrb.mxu2 %v298_v24  ;;  %435 = vmatpush.msrb.mxu3 %v328_v25  ;;  %v326_v22 = vld [vmem:[%s1148_s5 + $0x340] sm:$0xff]  ;;  %v307_v24 = vld [vmem:[%s1148_s5 + $0x2a8] sm:$0xff] }
  0x8f   :  { %v140_v35 = vmax.f32 %v695_v32, 0.0  ;;  %v141_v36 = vmax.f32 %v697_v33, 0.0  ;;  %v264_v31 = vld [vmem:[%s1148_s5 + $0x150] sm:$0xff]  ;;  %375 = vmatpush.msrb.mxu0 %v232_v29  ;;  %v339_v25 = vld [vmem:[%s1148_s5 + $0x3a8] sm:$0xff]  ;;  %v273_v29 = vld [vmem:[%s1148_s5 + $0x198] sm:$0xff] }
  0x90   :  { %395 = vmatpush.msrb.mxu1 %v264_v31  ;;  %436 = vmatpush.msrb.mxu3 %v326_v22  ;;  %v337_v31 = vld [vmem:[%s1148_s5 + $0x398] sm:$0xff]  ;;  %v335_v22 = vld [vmem:[%s1148_s5 + $0x388] sm:$0xff] }
  0x91   :  { %v146_v37 = vsel %vm142_vm1, %v140_v35, 0.0  ;;  %v149_v38 = vsel %vm148_vm2, %v141_v36, 0.0 }
  0x92   :  { %v147_v39 = vadd.f32 %v146_v37, %v145_v34  ;;  %v296_v34 = vld [vmem:[%s1148_s5 + $0x250] sm:$0xff]  ;;  %v230_v37 = vld [vmem:[%s1148_s5 + $0x40] sm:$0xff]  ;;  %396 = vmatpush.msrb.mxu1 %v262_v42  ;;  %v303_v42 = vld [vmem:[%s1148_s5 + $0x288] sm:$0xff] }
  0x93   :  { %415 = vmatpush.msrb.mxu2 %v296_v34  ;;  %376 = vmatpush.msrb.mxu0 %v230_v37  ;;  %v239_v34 = vld [vmem:[%s1148_s5 + $0x88] sm:$0xff] }
  0x94   :  { %v150_v40 = vadd.f32 %v149_v38, %v147_v39  ;;  %v271_v37 = vld [vmem:[%s1148_s5 + $0x188] sm:$0xff] }
  0x95   :  { %377 = vmatpush.msrb.mxu0 %v228_v23  ;;  %v237_v23 = vld [vmem:[%s1148_s5 + $0x78] sm:$0xff] }
  0x96   :  { %151 = vadd.xlane.f32.xlu0 %v150_v40 }
  0x97   :  { %378 = vmatpush.msrb.mxu0 %v226_v51  ;;  %v327_v51 = vld [vmem:[%s1148_s5 + $0x348] sm:$0xff] }
  0x99   :  { %379 = vmatpush.msrb.mxu0 %v224_v55  ;;  %v325_v55 = vld [vmem:[%s1148_s5 + $0x338] sm:$0xff] }
  0x9b   :  { %380 = vmatpush.msrb.mxu0 %v222_v59  ;;  %v291_v59 = vld [vmem:[%s1148_s5 + $0x228] sm:$0xff] }
  0x9d   :  { %465 = vmatpush.msra.mxu0 %v285_v0  ;;  %v289_v0 = vld [vmem:[%s1148_s5 + $0x218] sm:$0xff] }
  0x9f   :  { %466 = vmatpush.msra.mxu0 %v283_v4  ;;  %v287_v4 = vld [vmem:[%s1148_s5 + $0x208] sm:$0xff] }
  0xa1   :  { %467 = vmatpush.msra.mxu0 %v281_v8 }
  0xa3   :  { %468 = vmatpush.msra.mxu0 %v279_v12  ;;  %v208_v12 = vld [vmem:[%s1147_s4] sm:$0xf] }
  0xa5   :  { %469 = vmatpush.msra.mxu0 %v277_v16 }
  0xa7   :  { %470 = vmatpush.msra.mxu0 %v275_v21  ;;  %v211_v21 = vperm.slane %v208_v12, 1 }
  0xa9   :  { %471 = vmatpush.msra.mxu0 %v273_v29 }
  0xab   :  { %472 = vmatpush.msra.mxu0 %v271_v37 }
 0x109   :  { %v152_v28 = vpop.xlane.xlu0 %151 }
 0x10a   :  { %v160_v30 = vmul.f32 %v823_v19, %v152_v28  ;;  %v241_v28 = vld [vmem:[%s1148_s5 + $0x98] sm:$0xff] }
 0x10c   :  { %v852_v38 = vsub.f32 %v138_v26, %v160_v30  ;;  %v856_v39 = vsub.f32 %v139_v27, %v160_v30  ;;  %v860_v40 = vsub.f32 %v140_v35, %v160_v30  ;;  %v864_v41 = vsub.f32 %v141_v36, %v160_v30  ;;  %v294_v26 = vld [vmem:[%s1148_s5 + $0x240] sm:$0xff]  ;;  %v260_v35 = vld [vmem:[%s1148_s5 + $0x130] sm:$0xff]  ;;  %v305_v30 = vld [vmem:[%s1148_s5 + $0x298] sm:$0xff] }
 0x10d   :  { %v324_v36 = vld [vmem:[%s1148_s5 + $0x330] sm:$0xff]  ;;  %416 = vmatpush.msrb.mxu2 %v294_v26  ;;  %397 = vmatpush.msrb.mxu1 %v260_v35  ;;  %v269_v26 = vld [vmem:[%s1148_s5 + $0x178] sm:$0xff]  ;;  %v267_v35 = vld [vmem:[%s1148_s5 + $0x168] sm:$0xff] }
 0x10e   :  { %v165_v27 = vmul.f32 %v852_v38, %v852_v38  ;;  %v166_v32 = vmul.f32 %v856_v39, %v856_v39  ;;  %v167_v33 = vmul.f32 %v860_v40, %v860_v40  ;;  %v168_v43 = vmul.f32 %v864_v41, %v864_v41  ;;  %437 = vmatpush.msrb.mxu3 %v324_v36  ;;  %v299_v36 = vld [vmem:[%s1148_s5 + $0x268] sm:$0xff] }
 0x10f   :  { %398 = vmatpush.msrb.mxu1 %v258_v52  ;;  %417 = vmatpush.msrb.mxu2 %v292_v53  ;;  %v229_v52 = vld [vmem:[%s1148_s5 + $0x38] sm:$0xff] }
 0x110   :  { %v169_v44 = vsel %vm142_vm1, %v165_v27, 0.0  ;;  %v170_v45 = vsel %vm142_vm1, %v166_v32, 0.0  ;;  %v172_v47 = vsel %vm142_vm1, %v167_v33, 0.0  ;;  %v174_v49 = vsel %vm148_vm2, %v168_v43, 0.0  ;;  %438 = vmatpush.msrb.mxu3 %v322_v54  ;;  %v301_v27 = vld [vmem:[%s1148_s5 + $0x278] sm:$0xff]  ;;  %v235_v33 = vld [vmem:[%s1148_s5 + $0x68] sm:$0xff]  ;;  %473 = vmatpush.msra.mxu0 %v269_v26 }
 0x111   :  { %v171_v46 = vadd.f32 %v170_v45, %v169_v44  ;;  %399 = vmatpush.msrb.mxu1 %v256_v56  ;;  %418 = vmatpush.msrb.mxu2 %v290_v57  ;;  %v333_v32 = vld [vmem:[%s1148_s5 + $0x378] sm:$0xff]  ;;  %v331_v43 = vld [vmem:[%s1148_s5 + $0x368] sm:$0xff] }
 0x112   :  { %439 = vmatpush.msrb.mxu3 %v320_v58  ;;  %v233_v44 = vld [vmem:[%s1148_s5 + $0x58] sm:$0xff]  ;;  %474 = vmatpush.msra.mxu0 %v267_v35  ;;  %v227_v56 = vld [vmem:[%s1148_s5 + $0x28] sm:$0xff] }
 0x113   :  { %v173_v48 = vadd.f32 %v172_v47, %v171_v46  ;;  %400 = vmatpush.msrb.mxu1 %v254_v60  ;;  %419 = vmatpush.msrb.mxu2 %v288_v61  ;;  %v265_v45 = vld [vmem:[%s1148_s5 + $0x158] sm:$0xff]  ;;  %v259_v57 = vld [vmem:[%s1148_s5 + $0x128] sm:$0xff] }
 0x114   :  { %440 = vmatpush.msrb.mxu3 %v318_v62  ;;  %v297_v46 = vld [vmem:[%s1148_s5 + $0x258] sm:$0xff]  ;;  %475 = vmatpush.msra.mxu0 %v265_v45  ;;  %v323_v60 = vld [vmem:[%s1148_s5 + $0x328] sm:$0xff] }
 0x115   :  { %v175_v50 = vadd.f32 %v174_v49, %v173_v48  ;;  %485 = vmatpush.msra.mxu1 %v317_v1  ;;  %420 = vmatpush.msrb.mxu2 %v286_v2  ;;  %v329_v47 = vld [vmem:[%s1148_s5 + $0x358] sm:$0xff]  ;;  %v231_v48 = vld [vmem:[%s1148_s5 + $0x48] sm:$0xff] }
 0x116   :  { %445 = vmatpush.msra.mxu3 %v253_v63  ;;  %v263_v49 = vld [vmem:[%s1148_s5 + $0x148] sm:$0xff]  ;;  %v261_v53 = vld [vmem:[%s1148_s5 + $0x138] sm:$0xff] }
 0x117   :  { %176 = vadd.xlane.f32.xlu0 %v175_v50  ;;  %486 = vmatpush.msra.mxu1 %v315_v5  ;;  %v295_v50 = vld [vmem:[%s1148_s5 + $0x248] sm:$0xff]  ;;  %v293_v54 = vld [vmem:[%s1148_s5 + $0x238] sm:$0xff] }
 0x118   :  { %446 = vmatpush.msra.mxu3 %v251_v3  ;;  %553 = vmatpush.msk.msra.mxu2 %vm358_vm3, %v347_v6  ;;  %v225_v61 = vld [vmem:[%s1148_s5 + $0x18] sm:$0xff]  ;;  %v255_v2 = vld [vmem:[%s1148_s5 + $0x108] sm:$0xff] }
 0x119   :  { %487 = vmatpush.msra.mxu1 %v313_v9  ;;  %476 = vmatpush.msra.mxu0 %v263_v49  ;;  %v257_v63 = vld [vmem:[%s1148_s5 + $0x118] sm:$0xff]  ;;  %v319_v5 = vld [vmem:[%s1148_s5 + $0x308] sm:$0xff] }
 0x11a   :  { %447 = vmatpush.msra.mxu3 %v249_v7  ;;  %507 = vmatpush.msra.mxu2 %v345_v10  ;;  %v321_v1 = vld [vmem:[%s1148_s5 + $0x318] sm:$0xff]  ;;  %v194_v10 = vld [vmem:[%s1146_s3] sm:$0xf] }
 0x11b   :  { %488 = vmatpush.msra.mxu1 %v311_v13  ;;  %477 = vmatpush.msra.mxu0 %v261_v53  ;;  %v197_v16 = vperm.slane %v194_v10, 1 }
 0x11c   :  { %448 = vmatpush.msra.mxu3 %v247_v11  ;;  %508 = vmatpush.msra.mxu2 %v343_v14  ;;  %v196_v14 = vperm.slane %v194_v10, 0 }
 0x11d   :  { %489 = vmatpush.msra.mxu1 %v309_v17  ;;  %478 = vmatpush.msra.mxu0 %v259_v57  ;;  %v198_v17 = vperm.slane %v194_v10, 2 }
 0x11e   :  { %449 = vmatpush.msra.mxu3 %v245_v15  ;;  %509 = vmatpush.msra.mxu2 %v341_v18  ;;  %v210_v15 = vperm.slane %v208_v12, 0  ;;  %v199_v18 = vperm.slane %v194_v10, 3 }
 0x11f   :  { %490 = vmatpush.msra.mxu1 %v307_v24  ;;  %479 = vmatpush.msra.mxu0 %v257_v63  ;;  %v212_v24 = vperm.slane %v208_v12, 2 }
 0x120   :  { %450 = vmatpush.msra.mxu3 %v243_v20  ;;  %510 = vmatpush.msra.mxu2 %v339_v25  ;;  %v213_v25 = vperm.slane %v208_v12, 3 }
 0x121   :  { %491 = vmatpush.msra.mxu1 %v305_v30  ;;  %480 = vmatpush.msra.mxu0 %v255_v2 }
 0x122   :  { %451 = vmatpush.msra.mxu3 %v241_v28  ;;  %511 = vmatpush.msra.mxu2 %v337_v31 }
 0x123   :  { %492 = vmatpush.msra.mxu1 %v303_v42 }
 0x124   :  { %452 = vmatpush.msra.mxu3 %v239_v34  ;;  %512 = vmatpush.msra.mxu2 %v335_v22 }
 0x125   :  { %493 = vmatpush.msra.mxu1 %v301_v27 }
 0x126   :  { %453 = vmatpush.msra.mxu3 %v237_v23  ;;  %513 = vmatpush.msra.mxu2 %v333_v32 }
 0x127   :  { %494 = vmatpush.msra.mxu1 %v299_v36 }
 0x128   :  { %454 = vmatpush.msra.mxu3 %v235_v33  ;;  %514 = vmatpush.msra.mxu2 %v331_v43 }
 0x129   :  { %495 = vmatpush.msra.mxu1 %v297_v46 }
 0x12a   :  { %455 = vmatpush.msra.mxu3 %v233_v44  ;;  %515 = vmatpush.msra.mxu2 %v329_v47 }
 0x12b   :  { %496 = vmatpush.msra.mxu1 %v295_v50 }
 0x12c   :  { %456 = vmatpush.msra.mxu3 %v231_v48  ;;  %516 = vmatpush.msra.mxu2 %v327_v51 }
 0x12d   :  { %497 = vmatpush.msra.mxu1 %v293_v54 }
 0x12e   :  { %457 = vmatpush.msra.mxu3 %v229_v52  ;;  %517 = vmatpush.msra.mxu2 %v325_v55 }
 0x12f   :  { %498 = vmatpush.msra.mxu1 %v291_v59 }
 0x130   :  { %458 = vmatpush.msra.mxu3 %v227_v56  ;;  %518 = vmatpush.msra.mxu2 %v323_v60 }
 0x131   :  { %499 = vmatpush.msra.mxu1 %v289_v0 }
 0x132   :  { %459 = vmatpush.msra.mxu3 %v225_v61  ;;  %519 = vmatpush.msra.mxu2 %v321_v1 }
 0x133   :  { %500 = vmatpush.msra.mxu1 %v287_v4 }
 0x134   :  { %520 = vmatpush.msra.mxu2 %v319_v5 }
 0x18a   :  { %v177_v58 = vpop.xlane.xlu0 %176 }
 0x18b   :  { %v178_v62 = vmul.f32 %v177_v58, %v823_v19  ;;  %v223_v19 = vld [vmem:[%s1148_s5 + $0x8] sm:$0xff]  ;;  %s588_s5 = smov [#allocation2]  }
 0x18c   :  { %460 = vmatpush.msra.mxu3 %v223_v19  ;;  %s536_s10 = sshll.u32 %s588_s5, 4  ;;  %s537_s10 = int_to_ptr.vmem [resolvable:$true] %s536_s10 }
 0x18d   :  { %v179_v3 = vadd.f32 1e-05, %v178_v62 }
 0x18f   :  { %559 = vrsqrt.f32 %v179_v3  ;;  %vm186_vm6 = vweird.f32 %v179_v3 }
 0x195   :  { %v560_v6 = vpop.eup %559 }
 0x196   :  { %v181_v7 = vmul.f32 %v560_v6, %v179_v3  ;;  %vm187_vm5 = vweird.f32 %v560_v6 }
 0x197   :  { %vm188_vm7 = vmor %vm186_vm6, %vm187_vm5 }
 0x198   :  { %v182_v8 = vmul.f32 %v560_v6, %v181_v7 }
 0x19a   :  { %v183_v9 = vmul.f32 0.5, %v182_v8 }
 0x19c   :  { %v184_v11 = vsub.f32 1.5, %v183_v9 }
 0x19e   :  { %v185_v13 = vmul.f32 %v560_v6, %v184_v11 }
 0x1a0   :  { %v189_v20 = vsel %vm188_vm7, %v560_v6, %v185_v13 }
 0x1a1   :  { %v190_v28 = vmul.f32 %v189_v20, %v852_v38  ;;  %v191_v29 = vmul.f32 %v189_v20, %v856_v39  ;;  %v192_v30 = vmul.f32 %v189_v20, %v860_v40  ;;  %v193_v31 = vmul.f32 %v189_v20, %v864_v41  ;;  %v348_v38 = vld [vmem:[%s1149_s6] sm:$0x3] }
 0x1a2   :  { %v350_v33 = vperm.slane %v348_v38, 0  ;;  %v351_v36 = vperm.slane %v348_v38, 1 }
 0x1a3   :  { %v204_v34 = vmul.f32 %v196_v14, %v190_v28  ;;  %v205_v37 = vmul.f32 %v197_v16, %v191_v29  ;;  %v206_v42 = vmul.f32 %v198_v17, %v192_v30  ;;  %v207_v22 = vmul.f32 %v199_v18, %v193_v31 }
 0x1a5   :  { %v218_v23 = vadd.f32 %v210_v15, %v204_v34  ;;  %v219_v26 = vadd.f32 %v211_v21, %v205_v37  ;;  %v220_v27 = vadd.f32 %v212_v24, %v206_v42  ;;  %v221_v32 = vadd.f32 %v213_v25, %v207_v22 }
 0x1a7   :  { %381 = vmatmul.f32.vlgmr.msrb.gmra.mxu0 %v218_v23  ;;  %401 = vmatmul.f32.vlgmr.msrb.gmra.mxu1 %v219_v26 }
 0x1a8   :  { %421 = vmatmul.f32.vlgmr.msrb.gmra.mxu2 %v220_v27  ;;  %552 = vmatmul.msk.f32.vlgmr.msrb.gmra.mxu3 %vm354_vm8, %v221_v32 }
 0x1af   :  { %481 = vmatmul.f32.vlgmr.msra.gmra.mxu0 %v219_v26  ;;  %501 = vmatmul.f32.vlgmr.msra.gmra.mxu1 %v220_v27 }
 0x1b0   :  { %461 = vmatmul.f32.vlgmr.msra.gmra.mxu3 %v218_v23  ;;  %554 = vmatmul.msk.f32.vlgmr.msra.gmra.mxu2 %vm354_vm8, %v221_v32 }
 0x224   :  { %v382_v39 = vpop.f32.mrf.mxu0  ;;  %v402_v41 = vpop.f32.mrf.mxu1 }
 0x225   :  { %v383_v43 = vadd.f32 %v382_v39, %v350_v33 }
 0x227   :  { %v403_v47 = vadd.f32 %v402_v41, %v383_v43 }
 0x22b   :  { %v442_v40 = vpop.f32.mrf.mxu3  ;;  %v422_v35 = vpop.f32.mrf.mxu2 }
 0x22c   :  { %v482_v46 = vpop.f32.mrf.mxu0  ;;  %v502_v49 = vpop.f32.mrf.mxu1  ;;  %v423_v50 = vadd.f32 %v422_v35, %v403_v47 }
 0x22e   :  { %v443_v54 = vadd.f32 %v442_v40, %v423_v50 }
 0x233   :  { %v462_v44 = vpop.f32.mrf.mxu3  ;;  %v522_v52 = vpop.f32.mrf.mxu2 }
 0x234   :  { %v463_v45 = vadd.f32 %v462_v44, %v351_v36 }
 0x236   :  { %v483_v48 = vadd.f32 %v482_v46, %v463_v45 }
 0x238   :  { %v503_v51 = vadd.f32 %v502_v49, %v483_v48 }
 0x23a   :  { %v523_v53 = vadd.f32 %v522_v52, %v503_v51 }
 0x23c   :  { %v527_v55 = vrot.slane %v523_v53, 6 }
 0x23e   :  { %v528_v56 = vsel %vm142_vm1, %v443_v54, %v527_v55 }
 0x23f   :  { %530 = vst [vmem:[#allocation2] sm:$0xf] %v528_v56 }
 0x240   :  { %541 = dma.vmem_to_hbm [thread:$0]  %s537_s10, 64, %s539_s0, [#allocation3]  }
 0x241   :  { %585 = dma.done.wait [#allocation3], 64  }
 0x242   :  { %586 = vsyncadd [#allocation3], 4294967232 }
 0x243   :  { %546 = vsyncpa [#allocation3], 1 }

</bundles_post_ra>
